<compile_context>
chip_gen: v6e
topology: v6e:2x2x1
jax: 0.10.0
libtpu: 0.0.40
codegen_flags: <defaults>
</compile_context>

<pallas_src>
import math

import jax
import jax.numpy as jnp
from jax import lax
from jax.experimental import pallas as pl
from jax.experimental.pallas import tpu as pltpu

# f32 keeps the 1e-3 check comfortably; set to jnp.bfloat16 for native-MXU
# inputs (re-validate tolerance if you do).
_MXU_INPUT_DTYPE = jnp.float32


# ----------------------------------------------------------------------------
# Kernel 1: conv3x3 (two banded MXU matmuls) + MaxPool(2,1) + partial BN stats.
# ----------------------------------------------------------------------------
def conv_pool_stats_kernel(x_ref, w_ref, y_ref, s_ref, ss_ref):
    # x_ref : (2, rt, k2)   two row-shifted LHS copies (no in-kernel relayout)
    # w_ref : (2, k2, 2*WC) banded weights; cols = (parity, w, cout)
    # y_ref : (rt, WC)      conv+pool output, lane-dense (w, cout) pack
    # s_ref, ss_ref : (1, 1, WC) per-grid-step partial sum / sum-of-squares
    WC = y_ref.shape[1]

    r = jnp.dot(x_ref[0], w_ref[0], preferred_element_type=jnp.float32)
    r = r + jnp.dot(x_ref[1], w_ref[1], preferred_element_type=jnp.float32)
    # r columns are (parity, w, cout); MaxPool2d((2,1),(2,1)) = max over parity.
    # WC is a multiple of 128, so this split is lane-register aligned.
    pooled = jnp.maximum(r[:, :WC], r[:, WC:])                 # (rt, WC)

    # Partial BatchNorm statistics (channel = lane % Cout; folded in wrapper).
    s_ref[0] = jnp.sum(pooled, axis=0, keepdims=True)
    ss_ref[0] = jnp.sum(pooled * pooled, axis=0, keepdims=True)

    y_ref[...] = pooled.astype(y_ref.dtype)


# ----------------------------------------------------------------------------
# Kernel 2: per-channel scale/shift (BN affine folded in the wrapper) + ReLU,
# written in place (input_output_aliases) over row tiles.
# ----------------------------------------------------------------------------
def scale_shift_relu_kernel(y_ref, scale_ref, shift_ref, o_ref):
    o_ref[...] = jnp.maximum(
        y_ref[...] * scale_ref[...] + shift_ref[...], 0.0).astype(o_ref.dtype)


# ----------------------------------------------------------------------------
# Host-side helpers.
# ----------------------------------------------------------------------------
def _banded_pair_weights(w_hwio, W):
    """(3,3,Cin,Cout) conv weights -> (2, 2*(W+2)*Cin, 2*W*Cout) banded mats.

    Matrix g contracts the packed input row-pair (2hp+2g, 2hp+2g+1); output
    columns are packed as (parity p, w, cout); entry value is
    Wt[2g + j - p, w_in - w, ci, co] where valid, else 0.
    """
    _, _, Cin, Cout = w_hwio.shape
    KW = (W + 2) * Cin
    WC = W * Cout

    w_in = jnp.arange(W + 2)
    w_out = jnp.arange(W)
    dw = w_in[:, None] - w_out[None, :]                        # (W+2, W)
    w_ok = (dw >= 0) & (dw <= 2)
    dw_c = jnp.where(w_ok, dw, 0)

    g = jnp.arange(2)[:, None, None]
    j = jnp.arange(2)[None, :, None]
    p = jnp.arange(2)[None, None, :]
    dh = 2 * g + j - p                                         # (2, 2, 2)
    h_ok = (dh >= 0) & (dh <= 2)
    dh_c = jnp.where(h_ok, dh, 0)

    # (g, j, p, w_in, w, ci, co)
    wt = w_hwio[dh_c[:, :, :, None, None], dw_c[None, None, None, :, :]]
    mask = h_ok[:, :, :, None, None] & w_ok[None, None, None, :, :]
    wt = wt * mask[..., None, None].astype(w_hwio.dtype)
    # rows = (j, w_in, ci), cols = (p, w, co)
    wt = jnp.transpose(wt, (0, 1, 3, 5, 2, 4, 6))
    return wt.reshape(2, 2 * KW, 2 * WC)


def _vmem_config():
    """(vmem_limit_bytes, per-call tile budget), keyed on the TPU generation.

    v5e/v6e have 128 MiB physical VMEM -> larger scoped limit / tile budget;
    v7x has 64 MiB -> keep the 32 MiB limit and 8 MiB budget for headroom.
    Falls back to the conservative (v7x) numbers if the query fails.
    """
    try:
        cap = int(pltpu.get_tpu_info().vmem_capacity_bytes)
    except Exception:
        cap = 64 << 20
    if cap >= (96 << 20):
        return 64 << 20, 24 << 20
    return 32 << 20, 8 << 20


def _pick_m_tile(rows, k2, wc2, wc, budget):
    """Kernel-1 row tile (the MXU M dimension).

    Multiple of 8, grown toward 256-1024 rows as the VMEM budget allows (MXU
    occupancy + step-overhead amortisation), but capped at ceil(rows/2) so the
    1-D "parallel" grid always has >= 2 steps (both v7x TensorCores busy).
    """
    half = (rows + 1) // 2
    cap = max(8, ((half + 7) // 8) * 8)
    rt = min(cap, 1024)
    band = 2 * (2 * k2 * wc2) * 4                  # banded weights, dbl-buffered

    def need(r):
        return band + (2 * 2 * r * k2              # dbl-buffered (2, r, k2) input
                       + 2 * r * wc                # dbl-buffered (r, wc) output
                       + 2 * r * wc2               # matmul result + pooled scratch
                       ) * 4 + (512 << 10)

    while rt > 8 and need(rt) > budget:
        rt -= 8
    return rt


def _pick_row_tile2(rt1, grid1, wc, budget):
    """Kernel-2 row tile: a multiple of the kernel-1 tile (so it divides the
    padded row count exactly), grown toward ~1-2K rows for HBM-roofline
    streaming while keeping >= 2 grid steps whenever possible (v7x)."""
    best = 1
    for m in range(1, grid1 + 1):
        if grid1 % m:
            continue
        steps = grid1 // m
        if grid1 >= 2 and steps < 2:
            continue
        if rt1 * m > 2048:
            continue
        if (4 * rt1 * m * wc) * 4 + (256 << 10) > budget:
            continue
        best = m
    return rt1 * best, grid1 // best


# ----------------------------------------------------------------------------
# Wrapper: NCHW in / NCHW out, like the PyTorch module.
# ----------------------------------------------------------------------------
def down_h(x_nchw, w_hwio, b_unused, gamma, beta, *, eps=1e-5):
    N, Cin, H, W = x_nchw.shape
    Cout = w_hwio.shape[-1]
    assert H % 2 == 0, "MaxPool2d((2,1),(2,1)) needs even H for exact tiling"
    Hp = H // 2

    # Conv bias cancels exactly under training-mode BatchNorm (it commutes with
    # the (2,1) max-pool and is removed by the mean subtraction) -> never loaded.
    del b_unused

    vmem_limit, tile_budget = _vmem_config()

    # Pad Cout so the packed lane width WC = W * Cout_p is a multiple of 128:
    # keeps the parity-max split and all y stores on the unmasked lane path.
    # (No-op for these shapes; padded channels produce exact zeros and are
    # sliced away at the end.)
    need_mult = 128 // math.gcd(W, 128)
    Cout_p = ((Cout + need_mult - 1) // need_mult) * need_mult
    cpad = Cout_p - Cout
    w_p = jnp.pad(w_hwio, ((0, 0), (0, 0), (0, 0), (0, cpad)))
    gamma_p = jnp.pad(gamma.reshape(-1), (0, cpad), constant_values=1.0)
    beta_p = jnp.pad(beta.reshape(-1), (0, cpad))

    KW = (W + 2) * Cin
    k2 = 2 * KW
    WC = W * Cout_p
    wc2 = 2 * WC

    # Banded weights; for large W this needs a W-tiled band (not needed here).
    assert 2 * k2 * wc2 * 4 * 2 <= vmem_limit // 2, (
        "banded conv weights too large for VMEM; W-tiling required")
    w_band = _banded_pair_weights(w_p, W).astype(_MXU_INPUT_DTYPE)

    # NCHW -> zero-padded NHWC with (w, cin) merged on lanes and consecutive
    # input-row PAIRS merged on lanes, then BOTH row-shifted LHS copies stacked
    # so the kernel does no slicing/relayout at all.  This is one fused XLA
    # prep pass; in an NHWC pipeline the transpose disappears.
    x = jnp.transpose(x_nchw, (0, 2, 3, 1))
    x = jnp.pad(x, ((0, 0), (1, 1), (1, 1), (0, 0)))
    x = x.reshape(N, Hp + 1, k2)
    lhs = jnp.stack([x[:, :Hp], x[:, 1:]], axis=0).reshape(2, N * Hp, k2)

    rows = N * Hp
    rt = _pick_m_tile(rows, k2, wc2, WC, tile_budget)
    grid1 = -(-rows // rt)
    rows_p = grid1 * rt
    if rows_p != rows:
        # Zero rows: contribute 0 to conv output and to the BN sums -> exact.
        lhs = jnp.pad(lhs, ((0, 0), (0, rows_p - rows), (0, 0)))
    lhs = lhs.astype(_MXU_INPUT_DTYPE)

    y, s, ss = pl.pallas_call(
        conv_pool_stats_kernel,
        out_shape=(
            jax.ShapeDtypeStruct((rows_p, WC), jnp.float32),
            jax.ShapeDtypeStruct((grid1, 1, WC), jnp.float32),
            jax.ShapeDtypeStruct((grid1, 1, WC), jnp.float32),
        ),
        grid=(grid1,),
        in_specs=[
            pl.BlockSpec((2, rt, k2), lambda i: (0, i, 0)),
            pl.BlockSpec((2, k2, wc2), lambda i: (0, 0, 0)),
        ],
        out_specs=(
            pl.BlockSpec((rt, WC), lambda i: (i, 0)),
            pl.BlockSpec((1, 1, WC), lambda i: (i, 0, 0)),
            pl.BlockSpec((1, 1, WC), lambda i: (i, 0, 0)),
        ),
        compiler_params=pltpu.CompilerParams(
            dimension_semantics=("parallel",),
            vmem_limit_bytes=vmem_limit),
    )(lhs, w_band)

    # Fold the tiny partial stats into per-channel scale/shift (O(Cout) work).
    # NOTE: var = E[x^2] - mean^2 can cancel when |mean| >> std; fine at 1e-3
    # here (clamped at 0), switch to a centered second pass if that changes.
    count = jnp.float32(N * Hp * W)
    ch_sum = jnp.sum(s.reshape(grid1, W, Cout_p), axis=(0, 1))
    ch_ssq = jnp.sum(ss.reshape(grid1, W, Cout_p), axis=(0, 1))
    mean = ch_sum / count
    var = jnp.maximum(ch_ssq / count - mean * mean, 0.0)   # biased var, as BN
    scale = gamma_p * lax.rsqrt(var + eps)
    shift = beta_p - mean * scale
    scale_pk = jnp.tile(scale, W).reshape(1, WC)           # packed (w, cout) lanes
    shift_pk = jnp.tile(shift, W).reshape(1, WC)

    # Kernel 2: in-place y*scale + shift -> ReLU, gridded over row tiles.
    rt2, grid2 = _pick_row_tile2(rt, grid1, WC, tile_budget)
    out_packed = pl.pallas_call(
        scale_shift_relu_kernel,
        out_shape=jax.ShapeDtypeStruct((rows_p, WC), jnp.float32),
        grid=(grid2,),
        in_specs=[
            pl.BlockSpec((rt2, WC), lambda i: (i, 0)),
            pl.BlockSpec((1, WC), lambda i: (0, 0)),
            pl.BlockSpec((1, WC), lambda i: (0, 0)),
        ],
        out_specs=pl.BlockSpec((rt2, WC), lambda i: (i, 0)),
        input_output_aliases={0: 0},
        compiler_params=pltpu.CompilerParams(
            dimension_semantics=("parallel",),
            vmem_limit_bytes=vmem_limit),
    )(y, scale_pk, shift_pk)

    # Unpack only at the model boundary (NCHW is the module contract).
    out = out_packed[:rows].reshape(N, Hp, W, Cout_p)[..., :Cout]
    return jnp.transpose(out, (0, 3, 1, 2))                # back to NCHW


# ----------------------------------------------------------------------------
# Pure-JAX reference (keeps the conv bias; matches because it cancels).
# ----------------------------------------------------------------------------
def down_h_ref(x_nchw, w_hwio, b, gamma, beta, *, eps=1e-5):
    w_oihw = jnp.transpose(w_hwio, (3, 2, 0, 1))
    y = lax.conv_general_dilated(
        x_nchw, w_oihw, window_strides=(1, 1), padding=((1, 1), (1, 1)),
        dimension_numbers=("NCHW", "OIHW", "NCHW"))
    y = y + b.reshape(1, -1, 1, 1)
    N, C, H, W = y.shape
    y = y.reshape(N, C, H // 2, 2, W).max(axis=3)          # MaxPool (2,1)
    mean = y.mean(axis=(0, 2, 3), keepdims=True)
    var = ((y - mean) ** 2).mean(axis=(0, 2, 3), keepdims=True)
    yhat = (y - mean) / jnp.sqrt(var + eps)
    out = yhat * gamma.reshape(1, -1, 1, 1) + beta.reshape(1, -1, 1, 1)
    return jnp.maximum(out, 0.0)


if __name__ == "__main__":
    # Small shapes consistent with DownH(in_planes=4, out_planes=8).
    N, Cin, H, W = 2, 4, 16, 16
    Cout = 8

    key = jax.random.PRNGKey(0)
    kx, kw, kb, kg, kbt = jax.random.split(key, 5)

    x = jax.random.normal(kx, (N, Cin, H, W), jnp.float32)      # NCHW like PyTorch

    bound = 1.0 / jnp.sqrt(jnp.float32(Cin * 3 * 3))
    w = jax.random.uniform(kw, (3, 3, Cin, Cout), jnp.float32, -bound, bound)
    b = jax.random.uniform(kb, (1, Cout), jnp.float32, -bound, bound)
    gamma = 1.0 + 0.1 * jax.random.normal(kg, (1, Cout), jnp.float32)
    beta = 0.1 * jax.random.normal(kbt, (1, Cout), jnp.float32)

    out = jax.jit(down_h)(x, w, b, gamma, beta)
    out = jax.block_until_ready(out)

    ref = down_h_ref(x, w, b, gamma, beta)
    assert out.shape == (N, Cout, H // 2, W), out.shape
    assert jnp.allclose(out, ref, atol=1e-3, rtol=1e-3), float(
        jnp.max(jnp.abs(out - ref)))

    print("KERNEL_OK")
</pallas_src>

<mosaic_0001>
module attributes {stable_mosaic.version = 11 : i64} {
  func.func @conv_pool_stats_kernel(%arg0: i32, %arg1: memref<2x8x144xf32, #tpu.memory_space<vmem>>, %arg2: memref<2x144x256xf32, #tpu.memory_space<vmem>>, %arg3: memref<8x128xf32, #tpu.memory_space<vmem>>, %arg4: memref<1x1x128xf32, #tpu.memory_space<vmem>>, %arg5: memref<1x1x128xf32, #tpu.memory_space<vmem>>) attributes {dimension_semantics = [#tpu.dimension_semantics<parallel>], iteration_bounds = array<i64: 2>, scalar_prefetch = 0 : i64, scratch_operands = 0 : i64, tpu.core_type = #tpu.core_type<tc>, window_params = [{transform_indices = @transform_0, window_bounds = array<i64: 2, 8, 144>}, {pipeline_mode = #tpu.pipeline_mode<synchronous>, transform_indices = @transform_1, window_bounds = array<i64: 2, 144, 256>}, {transform_indices = @transform_2, window_bounds = array<i64: 8, 128>}, {transform_indices = @transform_3, window_bounds = array<i64: 1, 1, 128>}, {transform_indices = @transform_4, window_bounds = array<i64: 1, 1, 128>}]} {
    %c0 = arith.constant 0 : index
    %c0_0 = arith.constant 0 : index
    %c0_1 = arith.constant 0 : index
    %0 = vector.load %arg1[%c0, %c0_0, %c0_1] : memref<2x8x144xf32, #tpu.memory_space<vmem>>, vector<1x8x144xf32>
    %1 = vector.shape_cast %0 : vector<1x8x144xf32> to vector<8x144xf32>
    %c0_2 = arith.constant 0 : index
    %c0_3 = arith.constant 0 : index
    %c0_4 = arith.constant 0 : index
    %2 = vector.load %arg2[%c0_2, %c0_3, %c0_4] : memref<2x144x256xf32, #tpu.memory_space<vmem>>, vector<1x144x256xf32>
    %3 = vector.shape_cast %2 : vector<1x144x256xf32> to vector<144x256xf32>
    %cst = arith.constant dense<0.000000e+00> : vector<8x256xf32>
    %4 = tpu.matmul %1, %3, %cst {dimension_numbers = #tpu.dot_dimension_numbers<[1], [0], [0], [1], [0, 0, 1, 1], [], []>} : vector<8x144xf32>, vector<144x256xf32>, vector<8x256xf32> -> vector<8x256xf32>
    %c1 = arith.constant 1 : index
    %c0_5 = arith.constant 0 : index
    %c0_6 = arith.constant 0 : index
    %5 = vector.load %arg1[%c1, %c0_5, %c0_6] : memref<2x8x144xf32, #tpu.memory_space<vmem>>, vector<1x8x144xf32>
    %6 = vector.shape_cast %5 : vector<1x8x144xf32> to vector<8x144xf32>
    %c1_7 = arith.constant 1 : index
    %c0_8 = arith.constant 0 : index
    %c0_9 = arith.constant 0 : index
    %7 = vector.load %arg2[%c1_7, %c0_8, %c0_9] : memref<2x144x256xf32, #tpu.memory_space<vmem>>, vector<1x144x256xf32>
    %8 = vector.shape_cast %7 : vector<1x144x256xf32> to vector<144x256xf32>
    %cst_10 = arith.constant dense<0.000000e+00> : vector<8x256xf32>
    %9 = tpu.matmul %6, %8, %cst_10 {dimension_numbers = #tpu.dot_dimension_numbers<[1], [0], [0], [1], [0, 0, 1, 1], [], []>} : vector<8x144xf32>, vector<144x256xf32>, vector<8x256xf32> -> vector<8x256xf32>
    %10 = arith.addf %4, %9 : vector<8x256xf32>
    %11 = vector.extract_strided_slice %10 {offsets = [0, 0], sizes = [8, 128], strides = [1, 1]} : vector<8x256xf32> to vector<8x128xf32>
    %12 = vector.extract_strided_slice %10 {offsets = [0, 128], sizes = [8, 128], strides = [1, 1]} : vector<8x256xf32> to vector<8x128xf32>
    %13 = arith.maximumf %11, %12 : vector<8x128xf32>
    %cst_11 = arith.constant dense<0.000000e+00> : vector<128xf32>
    %14 = vector.multi_reduction <add>, %13, %cst_11 [0] : vector<8x128xf32> to vector<128xf32>
    %15 = vector.shape_cast %14 : vector<128xf32> to vector<1x128xf32>
    %c0_12 = arith.constant 0 : index
    %c0_13 = arith.constant 0 : index
    %c0_14 = arith.constant 0 : index
    %16 = vector.load %arg4[%c0_12, %c0_13, %c0_14] : memref<1x1x128xf32, #tpu.memory_space<vmem>>, vector<1x1x128xf32>
    %17 = vector.shape_cast %16 : vector<1x1x128xf32> to vector<1x128xf32>
    %18 = vector.shape_cast %15 : vector<1x128xf32> to vector<1x1x128xf32>
    tpu.vector_store %arg4[%c0_12, %c0_13, %c0_14], %18 {strides = array<i32>} : memref<1x1x128xf32, #tpu.memory_space<vmem>>, vector<1x1x128xf32>,
    %19 = arith.mulf %13, %13 : vector<8x128xf32>
    %cst_15 = arith.constant dense<0.000000e+00> : vector<128xf32>
    %20 = vector.multi_reduction <add>, %19, %cst_15 [0] : vector<8x128xf32> to vector<128xf32>
    %21 = vector.shape_cast %20 : vector<128xf32> to vector<1x128xf32>
    %c0_16 = arith.constant 0 : index
    %c0_17 = arith.constant 0 : index
    %c0_18 = arith.constant 0 : index
    %22 = vector.load %arg5[%c0_16, %c0_17, %c0_18] : memref<1x1x128xf32, #tpu.memory_space<vmem>>, vector<1x1x128xf32>
    %23 = vector.shape_cast %22 : vector<1x1x128xf32> to vector<1x128xf32>
    %24 = vector.shape_cast %21 : vector<1x128xf32> to vector<1x1x128xf32>
    tpu.vector_store %arg5[%c0_16, %c0_17, %c0_18], %24 {strides = array<i32>} : memref<1x1x128xf32, #tpu.memory_space<vmem>>, vector<1x1x128xf32>,
    %c0_19 = arith.constant 0 : index
    %c0_20 = arith.constant 0 : index
    %25 = vector.load %arg3[%c0_19, %c0_20] : memref<8x128xf32, #tpu.memory_space<vmem>>, vector<8x128xf32>
    tpu.vector_store %arg3[%c0_19, %c0_20], %13 {strides = array<i32>} : memref<8x128xf32, #tpu.memory_space<vmem>>, vector<8x128xf32>,
    return
  }
  func.func @transform_0(%arg0: i32) -> (i32, i32, i32) {
    %c0_i32 = arith.constant 0 : i32
    %c0_i32_0 = arith.constant 0 : i32
    %c0_i32_1 = arith.constant 0 : i32
    return %c0_i32, %arg0, %c0_i32_0 : i32, i32, i32
  }
  func.func @transform_1(%arg0: i32) -> (i32, i32, i32) {
    %c0_i32 = arith.constant 0 : i32
    %c0_i32_0 = arith.constant 0 : i32
    %c0_i32_1 = arith.constant 0 : i32
    %c0_i32_2 = arith.constant 0 : i32
    return %c0_i32, %c0_i32_0, %c0_i32_1 : i32, i32, i32
  }
  func.func @transform_2(%arg0: i32) -> (i32, i32) {
    %c0_i32 = arith.constant 0 : i32
    %c0_i32_0 = arith.constant 0 : i32
    return %arg0, %c0_i32 : i32, i32
  }
  func.func @transform_3(%arg0: i32) -> (i32, i32, i32) {
    %c0_i32 = arith.constant 0 : i32
    %c0_i32_0 = arith.constant 0 : i32
    %c0_i32_1 = arith.constant 0 : i32
    return %arg0, %c0_i32, %c0_i32_0 : i32, i32, i32
  }
  func.func @transform_4(%arg0: i32) -> (i32, i32, i32) {
    %c0_i32 = arith.constant 0 : i32
    %c0_i32_0 = arith.constant 0 : i32
    %c0_i32_1 = arith.constant 0 : i32
    return %arg0, %c0_i32, %c0_i32_0 : i32, i32, i32
  }
}

module attributes {stable_mosaic.version = 11 : i64} {
  func.func @scale_shift_relu_kernel(%arg0: i32, %arg1: memref<8x128xf32, #tpu.memory_space<vmem>>, %arg2: memref<1x128xf32, #tpu.memory_space<vmem>>, %arg3: memref<1x128xf32, #tpu.memory_space<vmem>>, %arg4: memref<8x128xf32, #tpu.memory_space<vmem>>) attributes {dimension_semantics = [#tpu.dimension_semantics<parallel>], iteration_bounds = array<i64: 2>, scalar_prefetch = 0 : i64, scratch_operands = 0 : i64, tpu.core_type = #tpu.core_type<tc>, window_params = [{transform_indices = @transform_0, window_bounds = array<i64: 8, 128>}, {pipeline_mode = #tpu.pipeline_mode<synchronous>, transform_indices = @transform_1, window_bounds = array<i64: 1, 128>}, {pipeline_mode = #tpu.pipeline_mode<synchronous>, transform_indices = @transform_2, window_bounds = array<i64: 1, 128>}, {transform_indices = @transform_3, window_bounds = array<i64: 8, 128>}]} {
    %c0 = arith.constant 0 : index
    %c0_0 = arith.constant 0 : index
    %0 = vector.load %arg1[%c0, %c0_0] : memref<8x128xf32, #tpu.memory_space<vmem>>, vector<8x128xf32>
    %c0_1 = arith.constant 0 : index
    %c0_2 = arith.constant 0 : index
    %1 = vector.load %arg2[%c0_1, %c0_2] : memref<1x128xf32, #tpu.memory_space<vmem>>, vector<1x128xf32>
    %2 = vector.broadcast %1 : vector<1x128xf32> to vector<8x128xf32>
    %3 = arith.mulf %0, %2 : vector<8x128xf32>
    %c0_3 = arith.constant 0 : index
    %c0_4 = arith.constant 0 : index
    %4 = vector.load %arg3[%c0_3, %c0_4] : memref<1x128xf32, #tpu.memory_space<vmem>>, vector<1x128xf32>
    %5 = vector.broadcast %4 : vector<1x128xf32> to vector<8x128xf32>
    %6 = arith.addf %3, %5 : vector<8x128xf32>
    %cst = arith.constant 0.000000e+00 : f32
    %7 = vector.broadcast %cst : f32 to vector<8x128xf32>
    %8 = arith.maximumf %6, %7 : vector<8x128xf32>
    %c0_5 = arith.constant 0 : index
    %c0_6 = arith.constant 0 : index
    %9 = vector.load %arg4[%c0_5, %c0_6] : memref<8x128xf32, #tpu.memory_space<vmem>>, vector<8x128xf32>
    tpu.vector_store %arg4[%c0_5, %c0_6], %8 {strides = array<i32>} : memref<8x128xf32, #tpu.memory_space<vmem>>, vector<8x128xf32>,
    return
  }
  func.func @transform_0(%arg0: i32) -> (i32, i32) {
    %c0_i32 = arith.constant 0 : i32
    %c0_i32_0 = arith.constant 0 : i32
    return %arg0, %c0_i32 : i32, i32
  }
  func.func @transform_1(%arg0: i32) -> (i32, i32) {
    %c0_i32 = arith.constant 0 : i32
    %c0_i32_0 = arith.constant 0 : i32
    %c0_i32_1 = arith.constant 0 : i32
    return %c0_i32, %c0_i32_0 : i32, i32
  }
  func.func @transform_2(%arg0: i32) -> (i32, i32) {
    %c0_i32 = arith.constant 0 : i32
    %c0_i32_0 = arith.constant 0 : i32
    %c0_i32_1 = arith.constant 0 : i32
    return %c0_i32, %c0_i32_0 : i32, i32
  }
  func.func @transform_3(%arg0: i32) -> (i32, i32) {
    %c0_i32 = arith.constant 0 : i32
    %c0_i32_0 = arith.constant 0 : i32
    return %arg0, %c0_i32 : i32, i32
  }
}

</mosaic_0001>

<bundles_post_ra>
// kernel: down_h.2
= control target key start
LH: loop header
LB: loop body
LE: loop exit
PB: predicated region body
PF: predicated region fallthrough
CT: control target
= control target key end

     0   :  { %s718_s15 = smov 0   ;;  %s720_s16 = smov 0   ;;  %s994_s0 = inlined_call_operand.vmem [shape: f32[2,16,144], index: 0, kind: input, shape index: {}]   ;;  %s995_s1 = inlined_call_operand.vmem [shape: f32[2,144,256], index: 1, kind: input, shape index: {}]   ;;  %s996_s2 = inlined_call_operand.vmem [shape: f32[16,128], index: 2, kind: output, shape index: {0}]   ;;  %s997_s3 = inlined_call_operand.vmem [shape: f32[2,1,128], index: 3, kind: output, shape index: {1}]   ;;  %s998_s4 = inlined_call_operand.vmem [shape: f32[2,1,128], index: 4, kind: output, shape index: {2}]  }
   0x1   :  { %s722_s17 = smov 0  }
   0x2 LB: > { %s592_s18 = sadd.s32 4294967295, %s691_s17   ;;  %s735_s19 = sadd.s32 1, %s691_s17   ;;  %s691_s17 = sphi %s722_s17, %s1001_s17   ;;  %s687_s16 = sphi %s720_s16, %s1000_s16   ;;  %s683_s15 = sphi %s718_s15, %s999_s15  }
   0x3   : > { %s19_s20 = ssub.s32 %s691_s17, %s735_s19  ;;  %s22_s21 = sadd.s32 1, %s687_s16 }
   0x4   : > { %p20_p0 = scmp.eq.s32.totalorder %s19_s20, 0  ;;  %p29_p1 = scmp.ne.s32.totalorder %s687_s16, %s683_s15 }
   0x5   : > { %p30_p2 = scmp.eq.s32.totalorder %s691_s17, 0  ;;  %p595_p4 = scmp.ge.s32.totalorder %s691_s17, 2 }
   0x6   : > { %s744_s22 = scalar_select %p20_p0, %s687_s16, %s22_s21  }
   0x7   : > { %p31_p3 = por %p30_p2, %p29_p1  ;;  %157 = sbr.rel (%p595_p4) target bundleno = 18 (0x12), region = 20 }
   0xc   : > { %160 = sbr.rel (!%p31_p3) target bundleno = 18 (0x12), region = 24  ;;  %s162_s23 = sand.u32 (%p31_p3), 1, %s687_s16  }
   0xd   : > { %s644_s24 = sshll.u32 (%p31_p3), %s691_s17, 4  ;;  %s596_s25 = sshll.u32 (%p31_p3), %s162_s23, 5 }
   0xe   : > { %s167_s28 = scalar_lea.vmem (%p31_p3), %s994_s0, %s644_s24  ;;  %s164_s29 = scalar_lea.vmem (%p31_p3), [#allocation2], %s596_s25 }
   0xf   : > { %v180_v0 = vld [vmem:[%s167_s28] sm:$0xff] (%p31_p3)  ;;  %v182_v1 = vld [vmem:[%s167_s28 + $0x8] sm:$0xff] (%p31_p3) }
  0x10   : > { %v184_v2 = vld [vmem:[%s167_s28 + $0x20] sm:$0xff] (%p31_p3)  ;;  %181 = vst [vmem:[%s164_s29] sm:$0xff] (%p31_p3), %v180_v0  ;;  %183 = vst [vmem:[%s164_s29 + $0x8] sm:$0xff] (%p31_p3), %v182_v1  ;;  %v186_v3 = vld [vmem:[%s167_s28 + $0x28] sm:$0xff] (%p31_p3) }
  0x11   : > { %185 = vst [vmem:[%s164_s29 + $0x10] sm:$0xff] %v184_v2  ;;  %187 = vst [vmem:[%s164_s29 + $0x18] sm:$0xff] %v186_v3 }
  0x12 PF: > { %p599_p5 = scmp.ge.s32.totalorder %s691_s17, 1  ;;  %p192_p6 = scmp.lt.s32.totalorder %s691_s17, 3 }
  0x14   : > { %p193_p7 = pnand %p599_p5, %p192_p6 }
  0x15   : > { %s199_s12 = sand.u32 (!%p193_p7), 1, %s683_s15   ;;  %p229_p8 = scmp.lt.s32.totalorder (!%p193_p7), %s592_s18, 1 }
  0x16   : > { %196 = sbr.rel (%p193_p7) target bundleno = 280 (0x118), region = 47  ;;  %s600_s30 = sshll.u32 (!%p193_p7), %s199_s12, 5 }
  0x17   : > { %s201_s7 = scalar_lea.vmem (!%p193_p7), [#allocation2], %s600_s30 }
  0x1b   : > { %v635_v4 = vld [vmem:[%s995_s1 + $0x218] sm:$0xff]  ;;  %v634_v6 = vld [vmem:[%s995_s1 + $0x210] sm:$0xff]  ;;  %v633_v8 = vld [vmem:[%s995_s1 + $0x208] sm:$0xff]  ;;  %vm317_vm0 = vcmask 130048   ;;  %s1003_s18 = smov (!%p229_p8, %s592_s18), 1 }
  0x1c   : > { %v272_v5 = vld [vmem:[%s995_s1 + $0xf8] sm:$0xff]  ;;  %321 = vmatprep.subr.mxu0 %v635_v4  ;;  %v271_v7 = vld [vmem:[%s995_s1 + $0xf0] sm:$0xff]  ;;  %v270_v9 = vld [vmem:[%s995_s1 + $0xe8] sm:$0xff]  ;;  %s601_s30 = sshll.u32 %s1003_s18, 3  ;;  %s235_s14 = scalar_lea.vmem %s997_s3, %s1003_s18 }
  0x1d   : > { %395 = vmatprep.subr.mxu1 %v272_v5  ;;  %322 = vmatpush1.msra.mxu0 %v634_v6  ;;  %v632_v10 = vld [vmem:[%s995_s1 + $0x200] sm:$0xff]  ;;  %v631_v12 = vld [vmem:[%s995_s1 + $0x1f8] sm:$0xff]  ;;  %v630_v14 = vld [vmem:[%s995_s1 + $0x1f0] sm:$0xff]  ;;  %s232_s13 = scalar_lea.vmem %s996_s2, %s601_s30  ;;  %s238_s23 = scalar_lea.vmem %s998_s4, %s1003_s18 }
  0x1e   : > { %396 = vmatpush1.msra.mxu1 %v271_v7  ;;  %v269_v11 = vld [vmem:[%s995_s1 + $0xe0] sm:$0xff]  ;;  %323 = vmatprep.subr.mxu0 %v633_v8  ;;  %v268_v13 = vld [vmem:[%s995_s1 + $0xd8] sm:$0xff]  ;;  %v267_v15 = vld [vmem:[%s995_s1 + $0xd0] sm:$0xff] }
  0x1f   : > { %397 = vmatprep.subr.mxu1 %v270_v9  ;;  %324 = vmatpush1.msra.mxu0 %v632_v10  ;;  %v629_v16 = vld [vmem:[%s995_s1 + $0x1e8] sm:$0xff]  ;;  %v628_v18 = vld [vmem:[%s995_s1 + $0x1e0] sm:$0xff]  ;;  %v627_v20 = vld [vmem:[%s995_s1 + $0x1d8] sm:$0xff] }
  0x20   : > { %398 = vmatpush1.msra.mxu1 %v269_v11  ;;  %v266_v17 = vld [vmem:[%s995_s1 + $0xc8] sm:$0xff]  ;;  %325 = vmatprep.subr.mxu0 %v631_v12  ;;  %v265_v19 = vld [vmem:[%s995_s1 + $0xc0] sm:$0xff]  ;;  %v264_v21 = vld [vmem:[%s995_s1 + $0xb8] sm:$0xff] }
  0x21   : > { %399 = vmatprep.subr.mxu1 %v268_v13  ;;  %326 = vmatpush1.msra.mxu0 %v630_v14  ;;  %v626_v22 = vld [vmem:[%s995_s1 + $0x1d0] sm:$0xff]  ;;  %v625_v24 = vld [vmem:[%s995_s1 + $0x1c8] sm:$0xff]  ;;  %v624_v26 = vld [vmem:[%s995_s1 + $0x1c0] sm:$0xff] }
  0x22   : > { %400 = vmatpush1.msra.mxu1 %v267_v15  ;;  %327 = vmatprep.subr.mxu0 %v629_v16  ;;  %v263_v23 = vld [vmem:[%s995_s1 + $0xb0] sm:$0xff]  ;;  %v262_v25 = vld [vmem:[%s995_s1 + $0xa8] sm:$0xff]  ;;  %v261_v27 = vld [vmem:[%s995_s1 + $0xa0] sm:$0xff] }
  0x23   : > { %401 = vmatprep.subr.mxu1 %v266_v17  ;;  %328 = vmatpush1.msra.mxu0 %v628_v18  ;;  %v623_v28 = vld [vmem:[%s995_s1 + $0x1b8] sm:$0xff]  ;;  %v622_v30 = vld [vmem:[%s995_s1 + $0x1b0] sm:$0xff]  ;;  %v621_v32 = vld [vmem:[%s995_s1 + $0x1a8] sm:$0xff] }
  0x24   : > { %402 = vmatpush1.msra.mxu1 %v265_v19  ;;  %329 = vmatprep.subr.mxu0 %v627_v20  ;;  %v260_v29 = vld [vmem:[%s995_s1 + $0x98] sm:$0xff]  ;;  %v259_v31 = vld [vmem:[%s995_s1 + $0x90] sm:$0xff]  ;;  %v258_v33 = vld [vmem:[%s995_s1 + $0x88] sm:$0xff] }
  0x25   : > { %403 = vmatprep.subr.mxu1 %v264_v21  ;;  %330 = vmatpush1.msra.mxu0 %v626_v22  ;;  %v620_v34 = vld [vmem:[%s995_s1 + $0x1a0] sm:$0xff]  ;;  %v619_v36 = vld [vmem:[%s995_s1 + $0x198] sm:$0xff]  ;;  %v618_v38 = vld [vmem:[%s995_s1 + $0x190] sm:$0xff] }
  0x26   : > { %404 = vmatpush1.msra.mxu1 %v263_v23  ;;  %331 = vmatprep.subr.mxu0 %v625_v24  ;;  %v257_v35 = vld [vmem:[%s995_s1 + $0x80] sm:$0xff]  ;;  %v256_v37 = vld [vmem:[%s995_s1 + $0x78] sm:$0xff]  ;;  %v255_v39 = vld [vmem:[%s995_s1 + $0x70] sm:$0xff] }
  0x27   : > { %405 = vmatprep.subr.mxu1 %v262_v25  ;;  %332 = vmatpush1.msra.mxu0 %v624_v26  ;;  %v617_v40 = vld [vmem:[%s995_s1 + $0x188] sm:$0xff]  ;;  %v616_v42 = vld [vmem:[%s995_s1 + $0x180] sm:$0xff]  ;;  %v615_v44 = vld [vmem:[%s995_s1 + $0x178] sm:$0xff] }
  0x28   : > { %406 = vmatpush1.msra.mxu1 %v261_v27  ;;  %333 = vmatprep.subr.mxu0 %v623_v28  ;;  %v254_v41 = vld [vmem:[%s995_s1 + $0x68] sm:$0xff]  ;;  %v253_v43 = vld [vmem:[%s995_s1 + $0x60] sm:$0xff]  ;;  %v252_v45 = vld [vmem:[%s995_s1 + $0x58] sm:$0xff] }
  0x29   : > { %407 = vmatprep.subr.mxu1 %v260_v29  ;;  %334 = vmatpush1.msra.mxu0 %v622_v30  ;;  %v614_v46 = vld [vmem:[%s995_s1 + $0x170] sm:$0xff]  ;;  %v613_v48 = vld [vmem:[%s995_s1 + $0x168] sm:$0xff]  ;;  %v612_v50 = vld [vmem:[%s995_s1 + $0x160] sm:$0xff] }
  0x2a   : > { %408 = vmatpush1.msra.mxu1 %v259_v31  ;;  %335 = vmatprep.subr.mxu0 %v621_v32  ;;  %v251_v47 = vld [vmem:[%s995_s1 + $0x50] sm:$0xff]  ;;  %v250_v49 = vld [vmem:[%s995_s1 + $0x48] sm:$0xff]  ;;  %v249_v51 = vld [vmem:[%s995_s1 + $0x40] sm:$0xff] }
  0x2b   : > { %409 = vmatprep.subr.mxu1 %v258_v33  ;;  %336 = vmatpush1.msra.mxu0 %v620_v34  ;;  %v611_v52 = vld [vmem:[%s995_s1 + $0x158] sm:$0xff]  ;;  %v610_v54 = vld [vmem:[%s995_s1 + $0x150] sm:$0xff]  ;;  %v609_v56 = vld [vmem:[%s995_s1 + $0x148] sm:$0xff] }
  0x2c   : > { %410 = vmatpush1.msra.mxu1 %v257_v35  ;;  %337 = vmatprep.subr.mxu0 %v619_v36  ;;  %v248_v53 = vld [vmem:[%s995_s1 + $0x38] sm:$0xff]  ;;  %v247_v55 = vld [vmem:[%s995_s1 + $0x30] sm:$0xff]  ;;  %v246_v57 = vld [vmem:[%s995_s1 + $0x28] sm:$0xff] }
  0x2d   : > { %411 = vmatprep.subr.mxu1 %v256_v37  ;;  %338 = vmatpush1.msra.mxu0 %v618_v38  ;;  %v608_v58 = vld [vmem:[%s995_s1 + $0x140] sm:$0xff]  ;;  %v607_v60 = vld [vmem:[%s995_s1 + $0x138] sm:$0xff]  ;;  %v606_v62 = vld [vmem:[%s995_s1 + $0x130] sm:$0xff] }
  0x2e   : > { %412 = vmatpush1.msra.mxu1 %v255_v39  ;;  %339 = vmatprep.subr.mxu0 %v617_v40  ;;  %v245_v59 = vld [vmem:[%s995_s1 + $0x20] sm:$0xff]  ;;  %v244_v61 = vld [vmem:[%s995_s1 + $0x18] sm:$0xff]  ;;  %v243_v63 = vld [vmem:[%s995_s1 + $0x10] sm:$0xff] }
  0x2f   : > { %413 = vmatprep.subr.mxu1 %v254_v41  ;;  %340 = vmatpush1.msra.mxu0 %v616_v42  ;;  %v605_v0 = vld [vmem:[%s995_s1 + $0x128] sm:$0xff]  ;;  %v604_v2 = vld [vmem:[%s995_s1 + $0x120] sm:$0xff]  ;;  %v639_v4 = vld [vmem:[%s995_s1 + $0x238] sm:$0xff] }
  0x30   : > { %414 = vmatpush1.msra.mxu1 %v253_v43  ;;  %341 = vmatprep.subr.mxu0 %v615_v44  ;;  %v242_v1 = vld [vmem:[%s995_s1 + $0x8] sm:$0xff]  ;;  %v241_v3 = vld [vmem:[%s995_s1] sm:$0xff]  ;;  %v276_v5 = vld [vmem:[%s995_s1 + $0x118] sm:$0xff] }
  0x31   : > { %415 = vmatprep.subr.mxu1 %v252_v45  ;;  %342 = vmatpush1.msra.mxu0 %v614_v46  ;;  %v638_v6 = vld [vmem:[%s995_s1 + $0x230] sm:$0xff]  ;;  %v637_v8 = vld [vmem:[%s995_s1 + $0x228] sm:$0xff]  ;;  %v636_v10 = vld [vmem:[%s995_s1 + $0x220] sm:$0xff] }
  0x32   : > { %416 = vmatpush1.msra.mxu1 %v251_v47  ;;  %343 = vmatprep.subr.mxu0 %v613_v48  ;;  %v275_v7 = vld [vmem:[%s995_s1 + $0x110] sm:$0xff]  ;;  %v274_v9 = vld [vmem:[%s995_s1 + $0x108] sm:$0xff]  ;;  %v603_v11 = vld [vmem:[%s201_s7 + $0x18] sm:$0xff] }
  0x33   : > { %417 = vmatprep.subr.mxu1 %v250_v49  ;;  %344 = vmatpush1.msra.mxu0 %v612_v50  ;;  %v273_v12 = vld [vmem:[%s995_s1 + $0x100] sm:$0xff]  ;;  %v240_v13 = vld [vmem:[%s201_s7 + $0x8] sm:$0xff]  ;;  %v602_v14 = vld [vmem:[%s201_s7 + $0x10] sm:$0xff] }
  0x34   : > { %418 = vmatpush1.msra.mxu1 %v249_v51  ;;  %345 = vmatprep.subr.mxu0 %v611_v52  ;;  %v239_v15 = vld [vmem:[%s201_s7] sm:$0xff] }
  0x35   : > { %419 = vmatprep.subr.mxu1 %v248_v53  ;;  %346 = vmatpush1.msra.mxu0 %v610_v54 }
  0x36   : > { %420 = vmatpush1.msra.mxu1 %v247_v55  ;;  %347 = vmatprep.subr.mxu0 %v609_v56 }
  0x37   : > { %421 = vmatprep.subr.mxu1 %v246_v57  ;;  %348 = vmatpush1.msra.mxu0 %v608_v58 }
  0x38   : > { %422 = vmatpush1.msra.mxu1 %v245_v59  ;;  %349 = vmatprep.subr.mxu0 %v607_v60 }
  0x39   : > { %423 = vmatprep.subr.mxu1 %v244_v61  ;;  %350 = vmatpush1.msra.mxu0 %v606_v62 }
  0x3a   : > { %424 = vmatpush1.msra.mxu1 %v243_v63  ;;  %351 = vmatprep.subr.mxu0 %v605_v0 }
  0x3b   : > { %425 = vmatprep.subr.mxu1 %v242_v1  ;;  %352 = vmatpush1.msra.mxu0 %v604_v2 }
  0x3c   : > { %426 = vmatpush1.msra.mxu1 %v241_v3  ;;  %381 = vmatprep.subr.mxu0 %v639_v4 }
  0x3d   : > { %455 = vmatprep.subr.mxu1 %v276_v5  ;;  %382 = vmatpush2.msra.mxu0 %v638_v6 }
  0x3e   : > { %456 = vmatpush2.msra.mxu1 %v275_v7  ;;  %383 = vmatprep.subr.mxu0 %v637_v8 }
  0x3f   : > { %457 = vmatprep.subr.mxu1 %v274_v9  ;;  %384 = vmatpush2.msra.mxu0 %v636_v10 }
  0x40   : > { %640 = vmatprep.mubr.msk.f32.mxu0 %vm317_vm0, %v603_v11  ;;  %458 = vmatpush2.msra.mxu1 %v273_v12 }
  0x41   : > { %641 = vmatprep.mubr.msk.f32.mxu1 %vm317_vm0, %v240_v13  ;;  %386 = vmatmul.mubr.f32.vlgmr.msra.gmra.mxu0 %v602_v14 }
  0x42   : > { %460 = vmatmul.mubr.f32.vlgmr.msra.gmra.mxu1 %v239_v15 }
 0x101   : > { %v387_v16 = vpop.f32.mrf.mxu0 }
 0x102   : > { %v461_v17 = vpop.f32.mrf.mxu1 }
 0x103   : > { %v389_v18 = vpop.f32.mrf.mxu0  ;;  %v462_v20 = vadd.f32 %v461_v17, %v387_v16 }
 0x104   : > { %v463_v19 = vpop.f32.mrf.mxu1 }
 0x105   : > { %v464_v21 = vadd.f32 %v463_v19, %v389_v18 }
 0x107   : > { %v466_v22 = vmax.f32 %v462_v20, %v464_v21 }
 0x109   : > { %v467_v23 = vrot.slane %v466_v22, 4  ;;  %v474_v24 = vmul.f32 %v466_v22, %v466_v22  ;;  %482 = vst [vmem:[%s232_s13] sm:$0xff] %v466_v22 }
 0x10b   : > { %v468_v25 = vadd.f32 %v467_v23, %v466_v22  ;;  %v475_v26 = vrot.slane %v474_v24, 4 }
 0x10d   : > { %v469_v27 = vrot.slane %v468_v25, 2  ;;  %v476_v28 = vadd.f32 %v475_v26, %v474_v24 }
 0x10f   : > { %v470_v29 = vadd.f32 %v469_v27, %v468_v25  ;;  %v477_v30 = vrot.slane %v476_v28, 2 }
 0x111   : > { %v471_v31 = vrot.slane %v470_v29, 1  ;;  %v478_v32 = vadd.f32 %v477_v30, %v476_v28 }
 0x113   : > { %v472_v33 = vadd.f32 %v471_v31, %v470_v29  ;;  %v479_v34 = vrot.slane %v478_v32, 1 }
 0x115   : > { %473 = vst [vmem:[%s235_s14] sm:$0x1] %v472_v33  ;;  %v480_v35 = vadd.f32 %v479_v34, %v478_v32 }
 0x117   : > { %481 = vst [vmem:[%s238_s23] sm:$0x1] %v480_v35 }
 0x118 PF: > { %p12_p9 = scmp.ge.s32.totalorder %s735_s19, 4   ;;  %s999_s15 = smov %s687_s16 }
 0x119   : > { %s1000_s16 = smov %s744_s22  ;;  %s1001_s17 = smov %s735_s19 }
 0x11a   :  { %14 = sbr.rel (!%p12_p9) target bundleno = 2 (0x2), region = 112 }

// kernel: tile.13
= control target key start
LH: loop header
LB: loop body
LE: loop exit
PB: predicated region body
PF: predicated region fallthrough
CT: control target
= control target key end

     0   :  { %s28_s0 = inlined_call_operand.vmem [shape: f32[8], index: 0, kind: input, shape index: {}]   ;;  %s29_s1 = inlined_call_operand.vmem [shape: f32[16,8], index: 1, kind: output, shape index: {}]  }
   0x1   :  { %v4_v0 = vld [vmem:[%s28_s0] ss:$0 sm:$0xff] }
   0x2   :  { %5 = vst [vmem:[%s29_s1] sm:$0xff] %v4_v0  ;;  %8 = vst [vmem:[%s29_s1 + $0x8] sm:$0xff] %v4_v0 }

// kernel: tile.14
= control target key start
LH: loop header
LB: loop body
LE: loop exit
PB: predicated region body
PF: predicated region fallthrough
CT: control target
= control target key end

     0   :  { %s133_s10 = smov 120   ;;  %s134_s11 = smov 104   ;;  %vm3_vm0 = vcmask 64512   ;;  %vm9_vm1 = vcmask 1048512   ;;  %vm15_vm2 = vcmask 982912   ;;  %vm21_vm3 = vcmask 917312   ;;  %s209_s0 = inlined_call_operand.vmem [shape: f32[16,8], index: 0, kind: input, shape index: {}]   ;;  %s210_s1 = inlined_call_operand.vmem [shape: f32[1,128], index: 1, kind: output, shape index: {}]  }
   0x1   :  { %v103_v0 = vld [vmem:[%s209_s0 + $0xf] sm:$0x1]   ;;  %v105_v1 = vld [vmem:[%s209_s0 + $0xd] sm:$0x1]   ;;  %v104_v2 = vld [vmem:[%s209_s0 + $0xe] sm:$0x1]  }
   0x2   :  { %7 = vrot.lane.b32.xlu0 %v103_v0, %s133_s10  ;;  %19 = vrot.lane.b32.xlu1 %v105_v1, %s134_s11  ;;  %v106_v3 = vld [vmem:[%s209_s0 + $0xc] sm:$0x1]   ;;  %s135_s16 = smov 112   ;;  %s136_s17 = smov 96   ;;  %v107_v4 = vld [vmem:[%s209_s0 + $0xb] sm:$0x1]  }
   0x3   :  { %v108_v5 = vld [vmem:[%s209_s0 + $0xa] sm:$0x1]   ;;  %v2_v6 = vld [vmem:[%s209_s0] sm:$0x1]   ;;  %s137_s24 = smov 88   ;;  %s138_s25 = smov 80  }
   0x4   :  { %4 = vst.msk [vmem:[#allocation0] sm:$0x1] %vm3_vm0, %v2_v6   ;;  %v109_v7 = vld [vmem:[%s209_s0 + $0x9] sm:$0x1]   ;;  %v110_v8 = vld [vmem:[%s209_s0 + $0x8] sm:$0x1]  }
   0x5   :  { %s139_s30 = smov 72   ;;  %s140_s2 = smov 64   ;;  %v111_v9 = vld [vmem:[%s209_s0 + $0x7] sm:$0x1]   ;;  %v112_v10 = vld [vmem:[%s209_s0 + $0x6] sm:$0x1]  }
   0x6   :  { %13 = vrot.lane.b32.xlu0 %v104_v2, %s135_s16  ;;  %25 = vrot.lane.b32.xlu1 %v106_v3, %s136_s17  ;;  %s141_s7 = smov 56   ;;  %s142_s8 = smov 48   ;;  %v113_v11 = vld [vmem:[%s209_s0 + $0x5] sm:$0x1]   ;;  %v114_v12 = vld [vmem:[%s209_s0 + $0x4] sm:$0x1]  }
   0x7   :  { %s143_s13 = smov 40   ;;  %s144_s14 = smov 32   ;;  %v115_v13 = vld [vmem:[%s209_s0 + $0x3] sm:$0x1]   ;;  %v116_v14 = vld [vmem:[%s209_s0 + $0x2] sm:$0x1]  }
   0x8   :  { %s145_s19 = smov 24   ;;  %s146_s20 = smov 16   ;;  %v117_v15 = vld [vmem:[%s209_s0 + $0x1] sm:$0x1]   ;;  %vm27_vm4 = vcmask 851712   ;;  %vm33_vm5 = vcmask 786112  }
   0x9   :  { %s147_s0 = smov 8   ;;  %vm39_vm6 = vcmask 720512   ;;  %vm45_vm7 = vcmask 654912   ;;  %vm51_vm8 = vcmask 589312   ;;  %vm57_vm9 = vcmask 523712  }
   0xa   :  { %31 = vrot.lane.b32.xlu0 %v107_v4, %s137_s24  ;;  %37 = vrot.lane.b32.xlu1 %v108_v5, %s138_s25  ;;  %vm63_vm10 = vcmask 458112   ;;  %vm69_vm11 = vcmask 392512   ;;  %vm75_vm12 = vcmask 326912   ;;  %vm81_vm13 = vcmask 261312  }
   0xb   :  { %vm87_vm14 = vcmask 195712   ;;  %vm93_vm15 = vcmask 130112  }
   0xe   :  { %43 = vrot.lane.b32.xlu0 %v109_v7, %s139_s30  ;;  %49 = vrot.lane.b32.xlu1 %v110_v8, %s140_s2 }
  0x12   :  { %55 = vrot.lane.b32.xlu0 %v111_v9, %s141_s7  ;;  %61 = vrot.lane.b32.xlu1 %v112_v10, %s142_s8 }
  0x16   :  { %67 = vrot.lane.b32.xlu0 %v113_v11, %s143_s13  ;;  %73 = vrot.lane.b32.xlu1 %v114_v12, %s144_s14 }
  0x1a   :  { %79 = vrot.lane.b32.xlu0 %v115_v13, %s145_s19  ;;  %85 = vrot.lane.b32.xlu1 %v116_v14, %s146_s20 }
  0x1e   :  { %91 = vrot.lane.b32.xlu0 %v117_v15, %s147_s0 }
  0x74   :  { %v8_v16 = vpop.permute.xlu0 %7   ;;  %v20_v17 = vpop.permute.xlu1 %19  }
  0x75   :  { %10 = vst.msk [vmem:[#allocation0] sm:$0x1] %vm9_vm1, %v8_v16  }
  0x78   :  { %v14_v18 = vpop.permute.xlu0 %13   ;;  %v26_v19 = vpop.permute.xlu1 %25  }
  0x79   :  { %16 = vst.msk [vmem:[#allocation0] sm:$0x1] %vm15_vm2, %v14_v18  }
  0x7a   :  { %22 = vst.msk [vmem:[#allocation0] sm:$0x1] %vm21_vm3, %v20_v17  }
  0x7b   :  { %28 = vst.msk [vmem:[#allocation0] sm:$0x1] %vm27_vm4, %v26_v19  }
  0x7c   :  { %v32_v20 = vpop.permute.xlu0 %31   ;;  %v38_v21 = vpop.permute.xlu1 %37  }
  0x7d   :  { %34 = vst.msk [vmem:[#allocation0] sm:$0x1] %vm33_vm5, %v32_v20  }
  0x7e   :  { %40 = vst.msk [vmem:[#allocation0] sm:$0x1] %vm39_vm6, %v38_v21  }
  0x80   :  { %v44_v22 = vpop.permute.xlu0 %43   ;;  %v50_v23 = vpop.permute.xlu1 %49  }
  0x81   :  { %46 = vst.msk [vmem:[#allocation0] sm:$0x1] %vm45_vm7, %v44_v22  }
  0x82   :  { %52 = vst.msk [vmem:[#allocation0] sm:$0x1] %vm51_vm8, %v50_v23  }
  0x84   :  { %v56_v24 = vpop.permute.xlu0 %55   ;;  %v62_v25 = vpop.permute.xlu1 %61  }
  0x85   :  { %58 = vst.msk [vmem:[#allocation0] sm:$0x1] %vm57_vm9, %v56_v24  }
  0x86   :  { %64 = vst.msk [vmem:[#allocation0] sm:$0x1] %vm63_vm10, %v62_v25  }
  0x88   :  { %v68_v26 = vpop.permute.xlu0 %67   ;;  %v74_v27 = vpop.permute.xlu1 %73  }
  0x89   :  { %70 = vst.msk [vmem:[#allocation0] sm:$0x1] %vm69_vm11, %v68_v26  }
  0x8a   :  { %76 = vst.msk [vmem:[#allocation0] sm:$0x1] %vm75_vm12, %v74_v27  }
  0x8c   :  { %v80_v28 = vpop.permute.xlu0 %79   ;;  %v86_v29 = vpop.permute.xlu1 %85  }
  0x8d   :  { %82 = vst.msk [vmem:[#allocation0] sm:$0x1] %vm81_vm13, %v80_v28  }
  0x8e   :  { %88 = vst.msk [vmem:[#allocation0] sm:$0x1] %vm87_vm14, %v86_v29  }
  0x90   :  { %v92_v30 = vpop.permute.xlu0 %91  }
  0x91   :  { %94 = vst.msk [vmem:[#allocation0] sm:$0x1] %vm93_vm15, %v92_v30  }
  0x98   :  { %v99_v31 = vld [vmem:[#allocation0] sm:$0x1] }
  0x99   :  { %102 = vst [vmem:[%s210_s1] sm:$0x1] %v99_v31 }

// kernel: down_h.3
= control target key start
LH: loop header
LB: loop body
LE: loop exit
PB: predicated region body
PF: predicated region fallthrough
CT: control target
= control target key end

     0   :  { %s261_s12 = smov 0   ;;  %s297_s0 = inlined_call_operand.vmem [shape: f32[16,128], index: 0, kind: input, shape index: {}, may-alias: {0,3}]   ;;  %s298_s1 = inlined_call_operand.vmem [shape: f32[1,128], index: 1, kind: input, shape index: {}]   ;;  %s299_s2 = inlined_call_operand.vmem [shape: f32[1,128], index: 2, kind: input, shape index: {}]   ;;  %s300_s3 = inlined_call_operand.vmem [shape: f32[16,128], index: 3, kind: output, shape index: {}, may-alias: {0,3}]  }
   0x1 LB: > { %s238_s13 = sadd.s32 4294967295, %s263_s12   ;;  %p242_p0 = scmp.ge.s32.totalorder %s263_s12, 1  ;;  %s263_s12 = sphi %s261_s12, %s13_s12  }
   0x2   : > { %p136_p1 = scmp.lt.s32.totalorder %s263_s12, 3 }
   0x4   : > { %p137_p2 = pnand %p242_p0, %p136_p1 }
   0x5   : > { %p158_p3 = scmp.lt.s32.totalorder (!%p137_p2), %s238_s13, 1 }
   0x6   : > { %140 = sbr.rel (%p137_p2) target bundleno = 22 (0x16), region = 32 }
   0xb   : > { %s302_s13 = smov (!%p158_p3, %s238_s13), 1  ;;  %v245_v0 = vld [vmem:[%s298_s1] ss:$0 sm:$0xff] }
   0xc   : > { %s243_s14 = sshll.u32 %s302_s13, 3  ;;  %v246_v2 = vld [vmem:[%s299_s2] ss:$0 sm:$0xff] }
   0xd   : > { %s161_s19 = scalar_lea.vmem %s297_s0, %s243_s14  ;;  %s165_s24 = scalar_lea.vmem %s300_s3, %s243_s14 }
   0xe   : > { %v166_v1 = vld [vmem:[%s161_s19] sm:$0xff] }
   0xf   : > { %v174_v3 = vmul.f32 %v245_v0, %v166_v1 }
  0x11   : > { %v182_v4 = vadd.f32 %v246_v2, %v174_v3 }
  0x13   : > { %v183_v5 = vmax.f32 %v182_v4, 0.0 }
  0x15   : > { %184 = vst [vmem:[%s165_s24] sm:$0xff] %v183_v5 }
  0x16 PF: > { %s13_s12 = sadd.s32 1, %s263_s12  }
  0x17   : > { %p10_p4 = scmp.ge.s32.totalorder %s13_s12, 4  }
  0x19   :  { %12 = sbr.rel (!%p10_p4) target bundleno = 1 (0x1), region = 62 }

</bundles_post_ra>
